<compile_context>
chip_gen: v7x
topology: tpu7x:2x2x1
jax: 0.10.0
libtpu: 0.0.40
codegen_flags: <defaults>
</compile_context>

<pallas_src>
import functools

import jax
import jax.numpy as jnp
from jax import lax
from jax.experimental import pallas as pl
from jax.experimental.pallas import tpu as pltpu

EPS = 1e-5


def _round_up(v, m):
    return (v + m - 1) // m * m


def _vmem_limit_bytes():
    """Generation-aware scoped-VMEM budget (v5e/v6e: 128 MiB, v7x: 64 MiB/TC)."""
    cap = 64 * 1024 * 1024
    try:
        cap = int(getattr(pltpu.get_tpu_info(), "vmem_capacity_bytes", cap))
    except Exception:
        pass
    return int(min(cap * 3 // 4, 96 * 1024 * 1024))


VMEM_LIMIT = _vmem_limit_bytes()


def _pick_row_tile(spatial, bytes_per_row, vmem_limit, max_rows=2048):
    """Largest divisor of `spatial` that is a multiple of 8, <= max_rows, and
    whose double-buffered blocks fit within a fraction of the VMEM budget."""
    budget = vmem_limit // 4
    cap = min(max_rows, max(8, budget // max(bytes_per_row, 1)))
    if spatial <= cap:
        return spatial
    t = cap - cap % 8
    while t >= 8:
        if spatial % t == 0:
            return t
        t -= 8
    # TODO(synk): an awkward SP with no multiple-of-8 divisor <= cap falls back
    # to one full-row tile, which could exceed the VMEM budget for huge images.
    return spatial


def _fused_conv_bn_kernel(patches_ref, w_ref, gamma_ref, beta_ref, out_ref,
                          sum_sc, ssq_sc, scale_sc, shift_sc, *, total_px):
    """Fused conv (one K=16*C_in matmul) + training-mode BN.

    grid = (phase, image, row_tile), all 'arbitrary' (cross-step state).
      patches_ref : (1, TS, 16*C_in) bf16   im2col rows for this (image, tile)
      w_ref       : (16*C_in, CP)    bf16   flattened conv kernel, CP lane-dense
      gamma/beta  : (1, CP)          f32
      out_ref     : (1, TS, CP)      f32    written only in phase 1
      *_sc        : (1, CP)          f32    persistent VMEM scratch
    """
    p = pl.program_id(0)
    n = pl.program_id(1)
    t = pl.program_id(2)
    is_first = jnp.logical_and(n == 0, t == 0)
    is_last = jnp.logical_and(n == pl.num_programs(1) - 1,
                              t == pl.num_programs(2) - 1)

    # Conv as ONE full-depth matmul (bf16 operands, f32 MXU accumulation).
    y = jnp.dot(patches_ref[0], w_ref[...], preferred_element_type=jnp.float32)

    @pl.when(jnp.logical_and(p == 0, is_first))
    def _init():
        sum_sc[...] = jnp.zeros_like(sum_sc)
        ssq_sc[...] = jnp.zeros_like(ssq_sc)

    @pl.when(p == 0)
    def _accumulate():
        sum_sc[...] += jnp.sum(y, axis=0, keepdims=True)
        ssq_sc[...] += jnp.sum(y * y, axis=0, keepdims=True)

    @pl.when(jnp.logical_and(p == 0, is_last))
    def _finalize():
        m = jnp.float32(total_px)
        mean = sum_sc[...] / m
        # TODO(synk): E[y^2]-E[y]^2 can lose precision for large-mean channels;
        # a centered/Welford combine would be more robust in that regime.
        var = jnp.maximum(ssq_sc[...] / m - mean * mean, 0.0)
        g = gamma_ref[...] * lax.rsqrt(var + EPS)
        scale_sc[...] = g
        shift_sc[...] = beta_ref[...] - mean * g

    @pl.when(p == 1)
    def _apply():
        # f32 output kept for accuracy; emit bf16 here when chaining into the
        # next bf16 conv block (halves the write + the next layer's read).
        out_ref[0] = y * scale_sc[...] + shift_sc[...]


@jax.jit
def encoder_conv_bn(x_nchw, conv_w, conv_b, bn_gamma, bn_beta):
    """Conv2d(k=4, s=2, p=1) + training-mode BatchNorm2d.

    x_nchw : (N, C_in, H, W) f32, H and W even.
    conv_w : (C_out, C_in, 4, 4) torch layout.
    conv_b : accepted for parity, unused (cancels in training-mode BN).
    """
    del conv_b  # a bias added before training-mode BN cancels in (y - mean)
    N, C_in, H, W = x_nchw.shape
    C_out = conv_w.shape[0]
    OH, OW = H // 2, W // 2
    SP = OH * OW                              # output pixels per image
    K16 = 16 * C_in                           # full 4x4 window folded into K
    CP = _round_up(max(C_out, 128), 128)      # lane-dense padded channels

    # ---- layout glue: NCHW -> NHWC, pad=1, 4x4/stride-2 im2col (bf16) --------
    x = jnp.transpose(x_nchw, (0, 2, 3, 1))
    xp = jnp.pad(x, ((0, 0), (1, 1), (1, 1), (0, 0)))
    cols = [xp[:, kh:kh + 2 * OH:2, kw:kw + 2 * OW:2, :]
            for kh in range(4) for kw in range(4)]
    patches = jnp.concatenate(cols, axis=-1).reshape(N, SP, K16)
    patches = patches.astype(jnp.bfloat16)

    # weights: torch (C_out, C_in, 4, 4) -> (16*C_in, CP), feature order (kh,kw,ci)
    w = jnp.transpose(conv_w, (2, 3, 1, 0)).reshape(K16, C_out)
    w = jnp.pad(w, ((0, 0), (0, CP - C_out))).astype(jnp.bfloat16)

    gamma = jnp.pad(bn_gamma.astype(jnp.float32), (0, CP - C_out)).reshape(1, CP)
    beta = jnp.pad(bn_beta.astype(jnp.float32), (0, CP - C_out)).reshape(1, CP)

    bytes_per_row = 2 * (K16 * 2 + CP * 4)    # double-buffered input + output
    TS = _pick_row_tile(SP, bytes_per_row, VMEM_LIMIT)
    grid = (2, N, SP // TS)                   # (phase, image, row tile)

    out = pl.pallas_call(
        functools.partial(_fused_conv_bn_kernel, total_px=N * SP),
        out_shape=jax.ShapeDtypeStruct((N, SP, CP), jnp.float32),
        grid=grid,
        in_specs=[
            pl.BlockSpec((1, TS, K16), lambda p, n, t: (n, t, 0)),
            pl.BlockSpec((K16, CP), lambda p, n, t: (0, 0)),
            pl.BlockSpec((1, CP), lambda p, n, t: (0, 0)),
            pl.BlockSpec((1, CP), lambda p, n, t: (0, 0)),
        ],
        # Phase 0 pins the (never-written) output block at 0 -> no garbage block
        # is ever flushed to HBM; phase 1 walks (n, t) and each block is written
        # back exactly once with final normalized data.
        out_specs=pl.BlockSpec((1, TS, CP), lambda p, n, t: (p * n, p * t, 0)),
        scratch_shapes=[pltpu.VMEM((1, CP), jnp.float32)] * 4,
        compiler_params=pltpu.CompilerParams(
            dimension_semantics=("arbitrary", "arbitrary", "arbitrary"),
            vmem_limit_bytes=VMEM_LIMIT,
        ),
    )(patches, w, gamma, beta)

    # TODO(synk): when chaining encoder blocks, keep this NHWC / CP-padded
    # layout (and bf16) between layers and drop the slice + transpose below.
    out = out[:, :, :C_out].reshape(N, OH, OW, C_out)
    return jnp.transpose(out, (0, 3, 1, 2))


# Name kept for continuity with the previous submission (same semantics,
# Encoder_Single_Block_2 is the C_out == C_in case).
encoder_single_block_2 = encoder_conv_bn


def _reference(x_nchw, conv_w, conv_b, bn_gamma, bn_beta):
    """Pure-JAX reference: conv (k4/s2/p1) + bias + training-mode BatchNorm2d."""
    y = lax.conv_general_dilated(
        x_nchw, conv_w, window_strides=(2, 2), padding=((1, 1), (1, 1)),
        dimension_numbers=("NCHW", "OIHW", "NCHW"),
        precision=lax.Precision.HIGHEST,
    ) + conv_b.reshape(1, -1, 1, 1)
    mean = jnp.mean(y, axis=(0, 2, 3), keepdims=True)
    var = jnp.mean((y - mean) ** 2, axis=(0, 2, 3), keepdims=True)
    y = (y - mean) * lax.rsqrt(var + EPS)
    return y * bn_gamma.reshape(1, -1, 1, 1) + bn_beta.reshape(1, -1, 1, 1)


if __name__ == "__main__":
    key = jax.random.PRNGKey(0)
    #            N  C_in C_out  H   W
    configs = [(2,  4,   4,    16, 16),   # Encoder_Single_Block_2 style (C -> C)
               (2,  8,   16,   32, 32)]   # Encoder_Single_Block_1 style (C -> 2C)
    for idx, (N, C_in, C_out, H, W) in enumerate(configs):
        key, kx, kw, kb, kg, kbt = jax.random.split(key, 6)
        x = jax.random.normal(kx, (N, C_in, H, W), dtype=jnp.float32)
        fan_in = C_in * 16
        bound = 1.0 / (fan_in ** 0.5)
        conv_w = jax.random.uniform(kw, (C_out, C_in, 4, 4), jnp.float32,
                                    -bound, bound)
        conv_b = jax.random.uniform(kb, (C_out,), jnp.float32, -bound, bound)
        bn_gamma = (jnp.ones((C_out,), jnp.float32)
                    + 0.1 * jax.random.normal(kg, (C_out,)))
        bn_beta = 0.1 * jax.random.normal(kbt, (C_out,))

        out = jax.block_until_ready(
            encoder_conv_bn(x, conv_w, conv_b, bn_gamma, bn_beta))
        assert out.shape == (N, C_out, H // 2, W // 2), out.shape

        # Reference on bf16-rounded inputs: the kernel deliberately feeds the
        # MXU bf16 operands (accumulation and all BN math stay f32).
        xq = x.astype(jnp.bfloat16).astype(jnp.float32)
        wq = conv_w.astype(jnp.bfloat16).astype(jnp.float32)
        ref = _reference(xq, wq, conv_b, bn_gamma, bn_beta)
        max_err = float(jnp.max(jnp.abs(out - ref)))
        assert jnp.allclose(out, ref, atol=1e-2, rtol=1e-2), (idx, max_err)

    print("KERNEL_OK")
</pallas_src>

<mosaic_0001>
module attributes {stable_mosaic.version = 11 : i64} {
  func.func @_fused_conv_bn_kernel(%arg0: i32, %arg1: i32, %arg2: i32, %arg3: memref<1x64x64xbf16, #tpu.memory_space<vmem>>, %arg4: memref<64x128xbf16, #tpu.memory_space<vmem>>, %arg5: memref<1x128xf32, #tpu.memory_space<vmem>>, %arg6: memref<1x128xf32, #tpu.memory_space<vmem>>, %arg7: memref<1x64x128xf32, #tpu.memory_space<vmem>>, %arg8: memref<1x128xf32, #tpu.memory_space<vmem>>, %arg9: memref<1x128xf32, #tpu.memory_space<vmem>>, %arg10: memref<1x128xf32, #tpu.memory_space<vmem>>, %arg11: memref<1x128xf32, #tpu.memory_space<vmem>>) attributes {dimension_semantics = [#tpu.dimension_semantics<arbitrary>, #tpu.dimension_semantics<arbitrary>, #tpu.dimension_semantics<arbitrary>], iteration_bounds = array<i64: 2, 2, 1>, scalar_prefetch = 0 : i64, scratch_operands = 4 : i64, tpu.core_type = #tpu.core_type<tc>, window_params = [{transform_indices = @transform_0, window_bounds = array<i64: 1, 64, 64>}, {pipeline_mode = #tpu.pipeline_mode<synchronous>, transform_indices = @transform_1, window_bounds = array<i64: 64, 128>}, {pipeline_mode = #tpu.pipeline_mode<synchronous>, transform_indices = @transform_2, window_bounds = array<i64: 1, 128>}, {pipeline_mode = #tpu.pipeline_mode<synchronous>, transform_indices = @transform_3, window_bounds = array<i64: 1, 128>}, {transform_indices = @transform_4, window_bounds = array<i64: 1, 64, 128>}]} {
    %c0_i32 = arith.constant 0 : i32
    %0 = arith.cmpi eq, %arg1, %c0_i32 : i32
    %c0_i32_0 = arith.constant 0 : i32
    %1 = arith.cmpi eq, %arg2, %c0_i32_0 : i32
    %2 = arith.andi %0, %1 : i1
    %c1_i32 = arith.constant 1 : i32
    %3 = arith.cmpi eq, %arg1, %c1_i32 : i32
    %c0_i32_1 = arith.constant 0 : i32
    %4 = arith.cmpi eq, %arg2, %c0_i32_1 : i32
    %5 = arith.andi %3, %4 : i1
    %c0 = arith.constant 0 : index
    %c0_2 = arith.constant 0 : index
    %c0_3 = arith.constant 0 : index
    %6 = vector.load %arg3[%c0, %c0_2, %c0_3] : memref<1x64x64xbf16, #tpu.memory_space<vmem>>, vector<1x64x64xbf16>
    %7 = vector.shape_cast %6 : vector<1x64x64xbf16> to vector<64x64xbf16>
    %c0_4 = arith.constant 0 : index
    %c0_5 = arith.constant 0 : index
    %8 = vector.load %arg4[%c0_4, %c0_5] : memref<64x128xbf16, #tpu.memory_space<vmem>>, vector<64x128xbf16>
    %cst = arith.constant dense<0.000000e+00> : vector<64x128xf32>
    %9 = tpu.matmul %7, %8, %cst {dimension_numbers = #tpu.dot_dimension_numbers<[1], [0], [0], [1], [0, 0, 1, 1], [], []>} : vector<64x64xbf16>, vector<64x128xbf16>, vector<64x128xf32> -> vector<64x128xf32>
    %c0_i32_6 = arith.constant 0 : i32
    %10 = arith.cmpi eq, %arg0, %c0_i32_6 : i32
    %11 = arith.andi %10, %2 : i1
    %12 = arith.extui %11 : i1 to i32
    %c0_i32_7 = arith.constant 0 : i32
    %13 = arith.cmpi ne, %12, %c0_i32_7 : i32
    scf.if %13 {
      %cst_14 = arith.constant 0.000000e+00 : f32
      %24 = vector.broadcast %cst_14 : f32 to vector<1x128xf32>
      %c0_15 = arith.constant 0 : index
      %c0_16 = arith.constant 0 : index
      %25 = vector.load %arg8[%c0_15, %c0_16] : memref<1x128xf32, #tpu.memory_space<vmem>>, vector<1x128xf32>
      tpu.vector_store %arg8[%c0_15, %c0_16], %24 {strides = array<i32>} : memref<1x128xf32, #tpu.memory_space<vmem>>, vector<1x128xf32>,
      %cst_17 = arith.constant 0.000000e+00 : f32
      %26 = vector.broadcast %cst_17 : f32 to vector<1x128xf32>
      %c0_18 = arith.constant 0 : index
      %c0_19 = arith.constant 0 : index
      %27 = vector.load %arg9[%c0_18, %c0_19] : memref<1x128xf32, #tpu.memory_space<vmem>>, vector<1x128xf32>
      tpu.vector_store %arg9[%c0_18, %c0_19], %26 {strides = array<i32>} : memref<1x128xf32, #tpu.memory_space<vmem>>, vector<1x128xf32>,
    } else {
    }
    %c0_i32_8 = arith.constant 0 : i32
    %14 = arith.cmpi eq, %arg0, %c0_i32_8 : i32
    %15 = arith.extui %14 : i1 to i32
    %c0_i32_9 = arith.constant 0 : i32
    %16 = arith.cmpi ne, %15, %c0_i32_9 : i32
    scf.if %16 {
      %c0_14 = arith.constant 0 : index
      %c0_15 = arith.constant 0 : index
      %24 = vector.load %arg8[%c0_14, %c0_15] : memref<1x128xf32, #tpu.memory_space<vmem>>, vector<1x128xf32>
      %cst_16 = arith.constant dense<0.000000e+00> : vector<128xf32>
      %25 = vector.multi_reduction <add>, %9, %cst_16 [0] : vector<64x128xf32> to vector<128xf32>
      %26 = vector.shape_cast %25 : vector<128xf32> to vector<1x128xf32>
      %27 = arith.addf %24, %26 : vector<1x128xf32>
      %c0_17 = arith.constant 0 : index
      %c0_18 = arith.constant 0 : index
      %28 = vector.load %arg8[%c0_17, %c0_18] : memref<1x128xf32, #tpu.memory_space<vmem>>, vector<1x128xf32>
      tpu.vector_store %arg8[%c0_17, %c0_18], %27 {strides = array<i32>} : memref<1x128xf32, #tpu.memory_space<vmem>>, vector<1x128xf32>,
      %c0_19 = arith.constant 0 : index
      %c0_20 = arith.constant 0 : index
      %29 = vector.load %arg9[%c0_19, %c0_20] : memref<1x128xf32, #tpu.memory_space<vmem>>, vector<1x128xf32>
      %30 = arith.mulf %9, %9 : vector<64x128xf32>
      %cst_21 = arith.constant dense<0.000000e+00> : vector<128xf32>
      %31 = vector.multi_reduction <add>, %30, %cst_21 [0] : vector<64x128xf32> to vector<128xf32>
      %32 = vector.shape_cast %31 : vector<128xf32> to vector<1x128xf32>
      %33 = arith.addf %29, %32 : vector<1x128xf32>
      %c0_22 = arith.constant 0 : index
      %c0_23 = arith.constant 0 : index
      %34 = vector.load %arg9[%c0_22, %c0_23] : memref<1x128xf32, #tpu.memory_space<vmem>>, vector<1x128xf32>
      tpu.vector_store %arg9[%c0_22, %c0_23], %33 {strides = array<i32>} : memref<1x128xf32, #tpu.memory_space<vmem>>, vector<1x128xf32>,
    } else {
    }
    %c0_i32_10 = arith.constant 0 : i32
    %17 = arith.cmpi eq, %arg0, %c0_i32_10 : i32
    %18 = arith.andi %17, %5 : i1
    %19 = arith.extui %18 : i1 to i32
    %c0_i32_11 = arith.constant 0 : i32
    %20 = arith.cmpi ne, %19, %c0_i32_11 : i32
    scf.if %20 {
      %c0_14 = arith.constant 0 : index
      %c0_15 = arith.constant 0 : index
      %24 = vector.load %arg8[%c0_14, %c0_15] : memref<1x128xf32, #tpu.memory_space<vmem>>, vector<1x128xf32>
      %cst_16 = arith.constant 1.280000e+02 : f32
      %25 = vector.broadcast %cst_16 : f32 to vector<1x128xf32>
      %26 = arith.divf %24, %25 : vector<1x128xf32>
      %c0_17 = arith.constant 0 : index
      %c0_18 = arith.constant 0 : index
      %27 = vector.load %arg9[%c0_17, %c0_18] : memref<1x128xf32, #tpu.memory_space<vmem>>, vector<1x128xf32>
      %cst_19 = arith.constant 1.280000e+02 : f32
      %28 = vector.broadcast %cst_19 : f32 to vector<1x128xf32>
      %29 = arith.divf %27, %28 : vector<1x128xf32>
      %30 = arith.mulf %26, %26 : vector<1x128xf32>
      %31 = arith.subf %29, %30 : vector<1x128xf32>
      %cst_20 = arith.constant 0.000000e+00 : f32
      %32 = vector.broadcast %cst_20 : f32 to vector<1x128xf32>
      %33 = arith.maximumf %31, %32 : vector<1x128xf32>
      %c0_21 = arith.constant 0 : index
      %c0_22 = arith.constant 0 : index
      %34 = vector.load %arg5[%c0_21, %c0_22] : memref<1x128xf32, #tpu.memory_space<vmem>>, vector<1x128xf32>
      %cst_23 = arith.constant 9.99999974E-6 : f32
      %35 = vector.broadcast %cst_23 : f32 to vector<1x128xf32>
      %36 = arith.addf %33, %35 : vector<1x128xf32>
      %37 = math.rsqrt %36 : vector<1x128xf32>
      %38 = arith.mulf %34, %37 : vector<1x128xf32>
      %c0_24 = arith.constant 0 : index
      %c0_25 = arith.constant 0 : index
      %39 = vector.load %arg10[%c0_24, %c0_25] : memref<1x128xf32, #tpu.memory_space<vmem>>, vector<1x128xf32>
      tpu.vector_store %arg10[%c0_24, %c0_25], %38 {strides = array<i32>} : memref<1x128xf32, #tpu.memory_space<vmem>>, vector<1x128xf32>,
      %c0_26 = arith.constant 0 : index
      %c0_27 = arith.constant 0 : index
      %40 = vector.load %arg6[%c0_26, %c0_27] : memref<1x128xf32, #tpu.memory_space<vmem>>, vector<1x128xf32>
      %41 = arith.mulf %26, %38 : vector<1x128xf32>
      %42 = arith.subf %40, %41 : vector<1x128xf32>
      %c0_28 = arith.constant 0 : index
      %c0_29 = arith.constant 0 : index
      %43 = vector.load %arg11[%c0_28, %c0_29] : memref<1x128xf32, #tpu.memory_space<vmem>>, vector<1x128xf32>
      tpu.vector_store %arg11[%c0_28, %c0_29], %42 {strides = array<i32>} : memref<1x128xf32, #tpu.memory_space<vmem>>, vector<1x128xf32>,
    } else {
    }
    %c1_i32_12 = arith.constant 1 : i32
    %21 = arith.cmpi eq, %arg0, %c1_i32_12 : i32
    %22 = arith.extui %21 : i1 to i32
    %c0_i32_13 = arith.constant 0 : i32
    %23 = arith.cmpi ne, %22, %c0_i32_13 : i32
    scf.if %23 {
      %c0_14 = arith.constant 0 : index
      %c0_15 = arith.constant 0 : index
      %24 = vector.load %arg10[%c0_14, %c0_15] : memref<1x128xf32, #tpu.memory_space<vmem>>, vector<1x128xf32>
      %25 = vector.broadcast %24 : vector<1x128xf32> to vector<64x128xf32>
      %26 = arith.mulf %9, %25 : vector<64x128xf32>
      %c0_16 = arith.constant 0 : index
      %c0_17 = arith.constant 0 : index
      %27 = vector.load %arg11[%c0_16, %c0_17] : memref<1x128xf32, #tpu.memory_space<vmem>>, vector<1x128xf32>
      %28 = vector.broadcast %27 : vector<1x128xf32> to vector<64x128xf32>
      %29 = arith.addf %26, %28 : vector<64x128xf32>
      %c0_18 = arith.constant 0 : index
      %c0_19 = arith.constant 0 : index
      %c0_20 = arith.constant 0 : index
      %30 = vector.load %arg7[%c0_18, %c0_19, %c0_20] : memref<1x64x128xf32, #tpu.memory_space<vmem>>, vector<1x64x128xf32>
      %31 = vector.shape_cast %30 : vector<1x64x128xf32> to vector<64x128xf32>
      %32 = vector.shape_cast %29 : vector<64x128xf32> to vector<1x64x128xf32>
      tpu.vector_store %arg7[%c0_18, %c0_19, %c0_20], %32 {strides = array<i32>} : memref<1x64x128xf32, #tpu.memory_space<vmem>>, vector<1x64x128xf32>,
    } else {
    }
    return
  }
  func.func @transform_0(%arg0: i32, %arg1: i32, %arg2: i32) -> (i32, i32, i32) {
    %c0_i32 = arith.constant 0 : i32
    %c0_i32_0 = arith.constant 0 : i32
    return %arg1, %arg2, %c0_i32 : i32, i32, i32
  }
  func.func @transform_1(%arg0: i32, %arg1: i32, %arg2: i32) -> (i32, i32) {
    %c0_i32 = arith.constant 0 : i32
    %c0_i32_0 = arith.constant 0 : i32
    %c0_i32_1 = arith.constant 0 : i32
    return %c0_i32, %c0_i32_0 : i32, i32
  }
  func.func @transform_2(%arg0: i32, %arg1: i32, %arg2: i32) -> (i32, i32) {
    %c0_i32 = arith.constant 0 : i32
    %c0_i32_0 = arith.constant 0 : i32
    %c0_i32_1 = arith.constant 0 : i32
    return %c0_i32, %c0_i32_0 : i32, i32
  }
  func.func @transform_3(%arg0: i32, %arg1: i32, %arg2: i32) -> (i32, i32) {
    %c0_i32 = arith.constant 0 : i32
    %c0_i32_0 = arith.constant 0 : i32
    %c0_i32_1 = arith.constant 0 : i32
    return %c0_i32, %c0_i32_0 : i32, i32
  }
  func.func @transform_4(%arg0: i32, %arg1: i32, %arg2: i32) -> (i32, i32, i32) {
    %0 = arith.muli %arg0, %arg1 : i32
    %1 = arith.muli %arg0, %arg2 : i32
    %c0_i32 = arith.constant 0 : i32
    %c0_i32_0 = arith.constant 0 : i32
    return %0, %1, %c0_i32 : i32, i32, i32
  }
}

</mosaic_0001>

<bundles_post_ra>
// kernel: encoder_conv_bn.1
= control target key start
LH: loop header
LB: loop body
LE: loop exit
PB: predicated region body
PF: predicated region fallthrough
CT: control target
= control target key end

     0   :  { %s794_s15 = smov 0   ;;  %s796_s16 = smov 0   ;;  %s940_s0 = inlined_call_operand.vmem [shape: bf16[2,64,64], index: 0, kind: input, shape index: {}]   ;;  %s941_s1 = inlined_call_operand.vmem [shape: bf16[64,128], index: 1, kind: input, shape index: {}]   ;;  %s942_s2 = inlined_call_operand.vmem [shape: f32[1,128], index: 2, kind: input, shape index: {}]   ;;  %s943_s3 = inlined_call_operand.vmem [shape: f32[1,128], index: 3, kind: input, shape index: {}]   ;;  %s944_s4 = inlined_call_operand.vmem [shape: f32[2,64,128], index: 4, kind: output, shape index: {}]  }
   0x1   :  { %s798_s17 = smov 0   ;;  %s800_s18 = smov 0  }
   0x2   :  { %s802_s19 = smov 0  }
   0x3 LB: > { %s29_s20 = sadd.s32 1, %s758_s17  ;;  %s33_s21 = sadd.s32 1, %s762_s18  ;;  %s766_s19 = sphi %s802_s19, %s14_s19   ;;  %s762_s18 = sphi %s800_s18, %s948_s18   ;;  %s758_s17 = sphi %s798_s17, %s947_s17   ;;  %s754_s16 = sphi %s796_s16, %s946_s16   ;;  %s750_s15 = sphi %s794_s15, %s945_s15  }
   0x4   : > { %p31_p0 = scmp.ge.s32.totalorder %s29_s20, 2  ;;  %p616_p1 = scmp.ge.s32.totalorder %s766_s19, 1 }
   0x5   : > { %p194_p2 = scmp.lt.s32.totalorder %s766_s19, 5 }
   0x6   : > { %s950_s20 = smov (%p31_p0, %s29_s20), 0  ;;  %s952_s21 = smov (!%p31_p0, %s33_s21), %s762_s18 }
   0x7   : > { %p195_p3 = pnand %p616_p1, %p194_p2  ;;  %p35_p4 = scmp.ge.s32.totalorder %s952_s21, 2 }
   0x8   : > { %s240_s22 = smul.u32 (!%p195_p3), %s750_s15, %s754_s16  ;;  %v718_v0 = vld [vmem:[%s941_s1] sm:$0xff] (!%p195_p3)   ;;  %p259_p5 = scmp.eq.s32.totalorder (!%p195_p3), %s750_s15, 1  ;;  %v719_v1 = vld [vmem:[%s941_s1 + $0x8] sm:$0xff] (!%p195_p3)   ;;  %v720_v2 = vld [vmem:[%s941_s1 + $0x10] sm:$0xff] (!%p195_p3)   ;;  %vm322_vm0 = vcmask (!%p195_p3), 523264  }
   0x9   : > { %s954_s21 = smov (%p35_p4, %s952_s21), 0  ;;  %198 = sbr.rel (%p195_p3) target bundleno = 319 (0x13f), region = 36 }
   0xa   : > { %p243_p6 = scmp.lt.s32.totalorder (!%p195_p3), %s240_s22, 1  ;;  %653 = vmatprep.subr.bf16.mxu0 (!%p195_p3), %v718_v0  ;;  %669 = vmatprep.subr.bf16.mxu1 (!%p195_p3), %v718_v0  ;;  %p231_p7 = scmp.lt.s32.totalorder (!%p195_p3), %s750_s15, 1  ;;  %v721_v3 = vld [vmem:[%s941_s1 + $0x18] sm:$0xff] (!%p195_p3)  }
   0xb   : > { %654 = vmatpush3.bf16.msra.mxu0 (!%p195_p3), %v718_v0  ;;  %673 = vmatpush3.bf16.msra.mxu1 (!%p195_p3), %v718_v0  ;;  %p255_p8 = scmp.eq.s32.totalorder (!%p195_p3), %s750_s15, 0  ;;  %p400_p9 = scmp.eq.s32.totalorder (!%p195_p3), %s754_s16, 0 }
   0xc   : > { %655 = vmatprep.subr.bf16.mxu0 (!%p195_p3), %v719_v1  ;;  %670 = vmatprep.subr.bf16.mxu1 (!%p195_p3), %v719_v1 }
   0xd   : > { %p401_p10 = pnand (!%p195_p3), %p400_p9, %p255_p8 }
   0xf   : > { %656 = vmatpush3.bf16.msra.mxu0 (!%p195_p3), %v719_v1  ;;  %674 = vmatpush3.bf16.msra.mxu1 (!%p195_p3), %v719_v1 }
  0x10   : > { %s956_s22 = smov (!%p243_p6, %s240_s22), 1  ;;  %657 = vmatprep.subr.bf16.mxu0 %v720_v2  ;;  %671 = vmatprep.subr.bf16.mxu1 %v720_v2  ;;  %v768_v16 = vmov (!%p401_p10), 0.0  }
  0x11   : > { %s232_s29 = scalar_select %p231_p7, %s750_s15, 1 }
  0x12   : > { %s642_s30 = sshll.u32 %s956_s22, 6  ;;  %405 = vst [vmem:[#allocation2] sm:$0x1] (!%p401_p10), %v768_v16  ;;  %406 = vst [vmem:[#allocation3] sm:$0x1] (!%p401_p10), %v768_v16 }
  0x13   : > { %s845_s7 = scalar_lea.vmem %s944_s4, %s642_s30  ;;  %s641_s8 = sshll.u32 %s232_s29, 5  ;;  %658 = vmatpush3.bf16.msra.mxu0 %v720_v2  ;;  %675 = vmatpush3.bf16.msra.mxu1 %v720_v2 }
  0x14   : > { %s238_s13 = scalar_lea.vmem %s940_s0, %s641_s8  ;;  %659 = vmatprep.subr.bf16.mxu0 %v721_v3  ;;  %672 = vmatprep.subr.bf16.mxu1 %v721_v3 }
  0x15   : > { %v722_v4 = vld [vmem:[%s238_s13] sm:$0xff]   ;;  %v723_v5 = vld [vmem:[%s238_s13 + $0x10] sm:$0xff]   ;;  %v724_v6 = vld [vmem:[%s238_s13 + $0x8] sm:$0xff]  }
  0x16   : > { %661 = vmatprep.mubr.msk.bf16.mxu0 %vm322_vm0, %v722_v4  ;;  %665 = vmatprep.mubr.msk.bf16.mxu1 %vm322_vm0, %v723_v5  ;;  %v725_v7 = vld [vmem:[%s238_s13 + $0x18] sm:$0xff]  }
  0x17   : > { %660 = vmatpush3.bf16.msra.mxu0 %v721_v3  ;;  %676 = vmatpush3.bf16.msra.mxu1 %v721_v3 }
  0x1a   : > { %662 = vmatmul.mubr.msk.bf16.vlgmr.msra.gmra.mrb[0].mxu0 %vm322_vm0, %v724_v6  ;;  %666 = vmatmul.mubr.msk.bf16.vlgmr.msra.gmra.mrb[0].mxu1 %vm322_vm0, %v725_v7 }
  0xea   : > { %404 = sbr.rel (%p401_p10) target bundleno = 241 (0xf1), region = 40 }
  0xed   : > { %v857_v8 = vpop.f32.mrb[0].mxu0  ;;  %v859_v9 = vpop.f32.mrb[0].mxu1 }
  0xee   : > { %v861_v10 = vpop.f32.mrb[1].mxu0  ;;  %v863_v11 = vpop.f32.mrb[1].mxu1 }
  0xef   : > { %v865_v12 = vpop.f32.mrb[2].mxu0  ;;  %v867_v13 = vpop.f32.mrb[2].mxu1 }
  0xf0   : > { %v869_v14 = vpop.f32.mrb[3].mxu0  ;;  %v871_v15 = vpop.f32.mrb[3].mxu1 }
  0xf1 PF: > { %p635_p11 = scmp.ne.s32.totalorder %s754_s16, 0 }
  0xf2   : > { %v411_v17 = vadd.f32 (!%p635_p11), %v869_v14, %v861_v10  ;;  %v427_v18 = vmul.f32 (!%p635_p11), %v861_v10, %v861_v10  ;;  %v428_v19 = vmul.f32 (!%p635_p11), %v869_v14, %v869_v14  ;;  %v429_v20 = vmul.f32 (!%p635_p11), %v857_v8, %v857_v8  ;;  %v410_v48 = vld [vmem:[#allocation2] sm:$0x1] (!%p635_p11)  ;;  %v426_v51 = vld [vmem:[#allocation3] sm:$0x1] (!%p635_p11) }
  0xf3   : > { %409 = sbr.rel (%p635_p11) target bundleno = 273 (0x111), region = 44  ;;  %v430_v22 = vmul.f32 (!%p635_p11), %v865_v12, %v865_v12  ;;  %v431_v25 = vmul.f32 (!%p635_p11), %v863_v11, %v863_v11  ;;  %v432_v28 = vmul.f32 (!%p635_p11), %v871_v15, %v871_v15  ;;  %v433_v31 = vmul.f32 (!%p635_p11), %v859_v9, %v859_v9 }
  0xf4   : > { %v412_v21 = vadd.f32 (!%p635_p11), %v857_v8, %v411_v17  ;;  %v435_v23 = vadd.f32 (!%p635_p11), %v428_v19, %v427_v18  ;;  %v434_v34 = vmul.f32 (!%p635_p11), %v867_v13, %v867_v13 }
  0xf6   : > { %v413_v24 = vadd.f32 (!%p635_p11), %v865_v12, %v412_v21  ;;  %v436_v26 = vadd.f32 (!%p635_p11), %v435_v23, %v429_v20 }
  0xf8   : > { %v414_v27 = vadd.f32 (!%p635_p11), %v413_v24, %v863_v11  ;;  %v437_v29 = vadd.f32 (!%p635_p11), %v436_v26, %v430_v22 }
  0xfa   : > { %v415_v30 = vadd.f32 %v414_v27, %v871_v15  ;;  %v438_v32 = vadd.f32 %v437_v29, %v431_v25 }
  0xfc   : > { %v416_v33 = vadd.f32 %v859_v9, %v415_v30  ;;  %v439_v35 = vadd.f32 %v438_v32, %v432_v28 }
  0xfe   : > { %v417_v36 = vadd.f32 %v867_v13, %v416_v33  ;;  %v440_v37 = vadd.f32 %v439_v35, %v433_v31 }
 0x100   : > { %v418_v38 = vrot.slane %v417_v36, 4  ;;  %v441_v39 = vadd.f32 %v440_v37, %v434_v34 }
 0x102   : > { %v419_v40 = vadd.f32 %v418_v38, %v417_v36  ;;  %v442_v41 = vrot.slane %v441_v39, 4 }
 0x104   : > { %v420_v42 = vrot.slane %v419_v40, 2  ;;  %v443_v43 = vadd.f32 %v442_v41, %v441_v39 }
 0x106   : > { %v421_v44 = vadd.f32 %v420_v42, %v419_v40  ;;  %v444_v45 = vrot.slane %v443_v43, 2 }
 0x108   : > { %v422_v46 = vrot.slane %v421_v44, 1  ;;  %v445_v47 = vadd.f32 %v444_v45, %v443_v43 }
 0x10a   : > { %v423_v49 = vadd.f32 %v422_v46, %v421_v44  ;;  %v446_v50 = vrot.slane %v445_v47, 1 }
 0x10c   : > { %v424_v52 = vadd.f32 %v423_v49, %v410_v48  ;;  %v447_v53 = vadd.f32 %v446_v50, %v445_v47 }
 0x10e   : > { %425 = vst [vmem:[#allocation2] sm:$0x1] %v424_v52  ;;  %v448_v54 = vadd.f32 %v447_v53, %v426_v51 }
 0x110   : > { %449 = vst [vmem:[#allocation3] sm:$0x1] %v448_v54 }
 0x111 PF: > { %p450_p12 = pnand %p400_p9, %p259_p5 }
 0x112   : > { %v462_v63 = vld [vmem:[%s942_s2] sm:$0x1] (!%p450_p12) }
 0x113   : > { %453 = sbr.rel (%p450_p12) target bundleno = 306 (0x132), region = 48  ;;  %v467_v2 = vld [vmem:[%s943_s3] sm:$0x1] (!%p450_p12) }
 0x115   : > { %v454_v55 = vld [vmem:[#allocation2] sm:$0x1] (!%p450_p12) }
 0x116   : > { %v456_v57 = vmul.f32 (!%p450_p12), 0.0078125, %v454_v55 }
 0x117   : > { %v457_v56 = vld [vmem:[#allocation3] sm:$0x1] (!%p450_p12) }
 0x118   : > { %v458_v58 = vmul.f32 (!%p450_p12), 0.0078125, %v457_v56  ;;  %v459_v59 = vmul.f32 (!%p450_p12), %v456_v57, %v456_v57 }
 0x11a   : > { %v460_v60 = vsub.f32 %v458_v58, %v459_v59 }
 0x11c   : > { %v461_v61 = vmax.f32 %v460_v60, 0.0 }
 0x11e   : > { %v463_v62 = vadd.f32 1e-05, %v461_v61 }
 0x120   : > { %726 = vrsqrt.f32 %v463_v62 }
 0x12a   : > { %v727_v0 = vpop.eup %726 }
 0x12b   : > { %v465_v1 = vmul.f32 %v727_v0, %v462_v63 }
 0x12d   : > { %466 = vst [vmem:[#allocation4] sm:$0x1] %v465_v1  ;;  %v468_v3 = vmul.f32 %v465_v1, %v456_v57 }
 0x12f   : > { %v469_v4 = vsub.f32 %v467_v2, %v468_v3 }
 0x131   : > { %470 = vst [vmem:[#allocation5] sm:$0x1] %v469_v4 }
 0x132 PF: > { %p636_p13 = scmp.ne.s32.totalorder %s754_s16, 1 }
 0x134   : > { %474 = sbr.rel (%p636_p13) target bundleno = 319 (0x13f), region = 52  ;;  %v637_v5 = vld [vmem:[#allocation4] ss:$0 sm:$0xff] (!%p636_p13) }
 0x135   : > { %v482_v7 = vmul.f32 (!%p636_p13), %v637_v5, %v861_v10  ;;  %v483_v16 = vmul.f32 (!%p636_p13), %v637_v5, %v869_v14  ;;  %v484_v17 = vmul.f32 (!%p636_p13), %v857_v8, %v637_v5  ;;  %v485_v18 = vmul.f32 (!%p636_p13), %v865_v12, %v637_v5 }
 0x136   : > { %v486_v19 = vmul.f32 (!%p636_p13), %v637_v5, %v863_v11  ;;  %v487_v20 = vmul.f32 (!%p636_p13), %v637_v5, %v871_v15  ;;  %v488_v21 = vmul.f32 (!%p636_p13), %v859_v9, %v637_v5  ;;  %v489_v10 = vmul.f32 (!%p636_p13), %v867_v13, %v637_v5 }
 0x138   : > { %v638_v6 = vld [vmem:[#allocation5] ss:$0 sm:$0xff] (!%p636_p13) }
 0x139   : > { %v497_v14 = vadd.f32 (!%p636_p13), %v638_v6, %v482_v7  ;;  %v498_v22 = vadd.f32 (!%p636_p13), %v638_v6, %v483_v16  ;;  %v499_v23 = vadd.f32 (!%p636_p13), %v638_v6, %v484_v17  ;;  %v500_v8 = vadd.f32 (!%p636_p13), %v638_v6, %v485_v18 }
 0x13a   : > { %v501_v24 = vadd.f32 (!%p636_p13), %v638_v6, %v486_v19  ;;  %v502_v25 = vadd.f32 (!%p636_p13), %v638_v6, %v487_v20  ;;  %v503_v12 = vadd.f32 (!%p636_p13), %v638_v6, %v488_v21  ;;  %v504_v26 = vadd.f32 (!%p636_p13), %v638_v6, %v489_v10 }
 0x13b   : > { %505 = vst [vmem:[%s845_s7] sm:$0xff] %v497_v14  ;;  %506 = vst [vmem:[%s845_s7 + $0x8] sm:$0xff] %v498_v22 }
 0x13c   : > { %507 = vst [vmem:[%s845_s7 + $0x10] sm:$0xff] %v499_v23  ;;  %508 = vst [vmem:[%s845_s7 + $0x18] sm:$0xff] %v500_v8 }
 0x13d   : > { %509 = vst [vmem:[%s845_s7 + $0x20] sm:$0xff] %v501_v24  ;;  %510 = vst [vmem:[%s845_s7 + $0x28] sm:$0xff] %v502_v25 }
 0x13e   : > { %511 = vst [vmem:[%s845_s7 + $0x30] sm:$0xff] %v503_v12  ;;  %512 = vst [vmem:[%s845_s7 + $0x38] sm:$0xff] %v504_v26 }
 0x13f PF: > { %s14_s19 = sadd.s32 1, %s766_s19   ;;  %s945_s15 = smov %s758_s17 }
 0x140   : > { %p11_p0 = scmp.ge.s32.totalorder %s14_s19, 6   ;;  %s946_s16 = smov %s762_s18 }
 0x141   : > { %s947_s17 = smov %s950_s20  ;;  %s948_s18 = smov %s954_s21 }
 0x142   :  { %13 = sbr.rel (!%p11_p0) target bundleno = 3 (0x3), region = 82 }

</bundles_post_ra>
